<compile_context>
chip_gen: v7x
topology: tpu7x:2x2x1
jax: 0.10.0
libtpu: 0.0.40
codegen_flags: <defaults>
</compile_context>

<pallas_src>
import functools

import jax
import jax.numpy as jnp
from jax import lax
from jax.experimental import pallas as pl
from jax.experimental.pallas import tpu as pltpu

_LANE = 128
_SUBLANE = 8

# Kernel gate order is (i, f, o, g); PyTorch order is (i, f, g, o).
# _GATE_PERM[kernel_slot] = torch gate index.
_GATE_PERM = (0, 1, 3, 2)


def _round_up(x, m):
    return (x + m - 1) // m * m


def _encoder_lstm_kernel(T, emb_ref, w_ref, b_ref, h0_ref, c0_ref,
                         out_ref, c_out_ref, xh_sc, c_sc):
    """Whole-sequence single-layer LSTM in one kernel invocation.

    emb_ref  : (Tp, Hp)    host-pre-gathered embedding rows (row t = token t)
    w_ref    : (2Hp, 4Hp)  fused [W_ih^T ; W_hh^T], gate order (i,f,o,g), padded
    b_ref    : (1, 4Hp)    b_ih + b_hh, same layout (f32)
    h0_ref   : (1, Hp)     initial hidden state
    c0_ref   : (1, Hp)     initial cell state
    out_ref  : (Tp, Hp)    hidden state for every step (row t); padded rows zero
    c_out_ref: (1, Hp)     final cell state
    xh_sc    : (1, 2Hp)    persistent [x ; h] staging buffer for the fused dot
    c_sc     : (1, Hp)     cell-state carry
    """
    hp = c_sc.shape[-1]

    out_ref[...] = jnp.zeros_like(out_ref)          # keep padded rows defined
    xh_sc[:, hp:2 * hp] = h0_ref[...]               # h half; x half set per step
    c_sc[...] = c0_ref[...]

    def step(t, carry):
        # x half only — the h half was written at the end of the previous step.
        xh_sc[:, 0:hp] = emb_ref[pl.ds(t, 1), :].astype(xh_sc.dtype)

        gates = jnp.dot(xh_sc[...].astype(w_ref.dtype), w_ref[...],
                        preferred_element_type=jnp.float32) + b_ref[...]

        ifo = jax.nn.sigmoid(gates[:, 0:3 * hp])     # i, f, o in one EUP launch
        i_g = ifo[:, 0:hp]
        f_g = ifo[:, hp:2 * hp]
        o_g = ifo[:, 2 * hp:3 * hp]
        g_g = jnp.tanh(gates[:, 3 * hp:4 * hp])

        c_new = f_g * c_sc[...] + i_g * g_g
        h_new = o_g * jnp.tanh(c_new)

        c_sc[...] = c_new
        xh_sc[:, hp:2 * hp] = h_new                  # h half for step t+1
        out_ref[pl.ds(t, 1), :] = h_new              # row t of output (VMEM)
        return carry

    # T is a trace-time constant; unroll short sequences for LLO visibility.
    lax.fori_loop(0, T, step, 0, unroll=(T <= 16))

    c_out_ref[...] = c_sc[...]


def _run_lstm_seq(tokens, params, h0_p, c0_p):
    """Run T LSTM steps inside one (grid-less) pallas_call. tokens: (T,) int32."""
    emb = params["embedding_p"]     # (V, Hp)
    w = params["w_fused"]           # (2Hp, 4Hp)
    b = params["b_p"]               # (1, 4Hp) f32
    Hp = emb.shape[1]
    T = int(tokens.shape[0])
    Tp = _round_up(max(T, 1), _SUBLANE)

    # Host-side embedding gather (free XLA gather) + sublane padding.
    emb_rows = emb[tokens]                                   # (T, Hp)
    emb_rows_p = jnp.zeros((Tp, Hp), emb.dtype).at[:T].set(emb_rows)

    # Resident working set (bytes, worst case f32). Raise scoped VMEM only if
    # needed (v5e default 16 MiB, v6e/v7x 32 MiB scoped; v7x 64 MiB physical —
    # for large H prefer bf16 weights via init_params(param_dtype=jnp.bfloat16)).
    need_bytes = 4 * (2 * Tp * Hp + 2 * Hp * 4 * Hp + 4 * Hp + 2 * Hp
                      + 3 * Hp + 2 * Hp)
    compiler_params = None
    if need_bytes > 12 * (1 << 20):
        compiler_params = pltpu.CompilerParams(
            vmem_limit_bytes=int(need_bytes * 1.5))

    vmem = pltpu.MemorySpace.VMEM
    out, c_last = pl.pallas_call(
        functools.partial(_encoder_lstm_kernel, T),
        out_shape=(
            jax.ShapeDtypeStruct((Tp, Hp), jnp.float32),
            jax.ShapeDtypeStruct((1, Hp), jnp.float32),
        ),
        in_specs=[pl.BlockSpec(memory_space=vmem)] * 5,
        out_specs=(pl.BlockSpec(memory_space=vmem),
                   pl.BlockSpec(memory_space=vmem)),
        scratch_shapes=[
            pltpu.VMEM((1, 2 * Hp), jnp.float32),   # persistent [x ; h]
            pltpu.VMEM((1, Hp), jnp.float32),       # cell carry
        ],
        compiler_params=compiler_params,
    )(emb_rows_p, w, b, h0_p, c0_p)
    return out, c_last


def encoder_lstm_forward(token, params, hidden, cell):
    """Pallas equivalent of EncoderLSTM.forward.

    `token` may be a scalar (matching the torch module, T=1) or a 1-D array of
    token ids (the whole sequence runs in a single pallas_call).
    Returns (output (T,1,H), (hidden (1,1,H), cell (1,1,H))).

    Note: batch is 1 per the module. With batch > 1 (or multiple sequences),
    stack them into the M dimension of the dot (and, on v7x, add a 'parallel'
    batch grid axis so the second TensorCore does useful work).
    """
    H = params["hidden_size"]
    Hp = params["embedding_p"].shape[1]

    h0 = jnp.zeros((1, Hp), jnp.float32).at[:, :H].set(
        hidden.reshape(1, H).astype(jnp.float32))
    c0 = jnp.zeros((1, Hp), jnp.float32).at[:, :H].set(
        cell.reshape(1, H).astype(jnp.float32))
    tokens = jnp.asarray(token, dtype=jnp.int32).reshape(-1)   # (T,)
    T = int(tokens.shape[0])

    out_p, c_p = _run_lstm_seq(tokens, params, h0, c0)

    out = out_p[:T, :H].reshape(T, 1, H)          # LSTM output sequence
    h1 = out_p[T - 1, :H].reshape(1, 1, H)        # final hidden == last output
    c1 = c_p[:, :H].reshape(1, 1, H)              # final cell
    return out, (h1, c1)


def init_params(key, input_size, hidden_size, param_dtype=jnp.float32):
    """Mirror nn.Embedding / nn.LSTM init; pre-pack padded, fused kernel layouts.

    param_dtype=jnp.bfloat16 halves weight/embedding DMA + residency on
    v6e/v7x (f32 accumulation kept); expect looser numerical tolerance.
    """
    H = hidden_size
    Hp = max(_LANE, _round_up(H, _LANE))
    k_emb, k_wih, k_whh, k_bih, k_bhh = jax.random.split(key, 5)
    bound = 1.0 / jnp.sqrt(jnp.float32(H))

    # nn.Embedding default: N(0, 1); nn.LSTM default: U(-1/sqrt(H), 1/sqrt(H))
    embedding = jax.random.normal(k_emb, (input_size, H), dtype=jnp.float32)
    w_ih = jax.random.uniform(k_wih, (4 * H, H), jnp.float32, -bound, bound)
    w_hh = jax.random.uniform(k_whh, (4 * H, H), jnp.float32, -bound, bound)
    b_ih = jax.random.uniform(k_bih, (4 * H,), jnp.float32, -bound, bound)
    b_hh = jax.random.uniform(k_bhh, (4 * H,), jnp.float32, -bound, bound)

    # ---- lane-padded, fused, gate-permuted layouts for the kernel ----
    emb_p = jnp.zeros((input_size, Hp), jnp.float32).at[:, :H].set(embedding)

    def _pad_gates_t(w):
        # w: (4H, H) torch layout -> transposed, padded, gate-permuted (Hp, 4Hp).
        # Kernel slot s holds torch gate _GATE_PERM[s] in columns [s*Hp, s*Hp+H).
        wt = w.T  # (H, 4H), torch gate order (i, f, g, o)
        wp = jnp.zeros((Hp, 4 * Hp), jnp.float32)
        for s, g in enumerate(_GATE_PERM):
            wp = wp.at[:H, s * Hp:s * Hp + H].set(wt[:, g * H:(g + 1) * H])
        return wp

    w_fused = jnp.concatenate(
        [_pad_gates_t(w_ih), _pad_gates_t(w_hh)], axis=0)       # (2Hp, 4Hp)

    b = b_ih + b_hh
    b_p = jnp.zeros((1, 4 * Hp), jnp.float32)
    for s, g in enumerate(_GATE_PERM):
        b_p = b_p.at[0, s * Hp:s * Hp + H].set(b[g * H:(g + 1) * H])

    return {
        "hidden_size": H,
        # raw params (for the pure-JAX reference)
        "embedding": embedding, "w_ih": w_ih, "w_hh": w_hh,
        "b_ih": b_ih, "b_hh": b_hh,
        # packed kernel params
        "embedding_p": emb_p.astype(param_dtype),
        "w_fused": w_fused.astype(param_dtype),
        "b_p": b_p,   # bias kept f32; added after the f32-accumulated matmul
    }


def _reference_step(token, params, h, c):
    """Pure-JAX single LSTM step (PyTorch gate order) for correctness checks."""
    H = params["hidden_size"]
    x = params["embedding"][token].reshape(1, H)
    gates = (x @ params["w_ih"].T + h @ params["w_hh"].T
             + (params["b_ih"] + params["b_hh"]).reshape(1, 4 * H))
    i_g = jax.nn.sigmoid(gates[:, 0:H])
    f_g = jax.nn.sigmoid(gates[:, H:2 * H])
    g_g = jnp.tanh(gates[:, 2 * H:3 * H])
    o_g = jax.nn.sigmoid(gates[:, 3 * H:4 * H])
    c_new = f_g * c + i_g * g_g
    h_new = o_g * jnp.tanh(c_new)
    return h_new, c_new


if __name__ == "__main__":
    input_size = 16    # vocab size
    hidden_size = 32
    n_layers = 1
    batch = 1
    seq_len = 8

    key = jax.random.PRNGKey(0)
    params = init_params(key, input_size, hidden_size)

    # initHidden equivalent
    hidden = jnp.zeros((n_layers, batch, hidden_size), dtype=jnp.float32)
    cell = jnp.zeros((n_layers, batch, hidden_size), dtype=jnp.float32)

    # ---- 1) single-token forward (matches the torch module semantics) ----
    token = jnp.int32(3)
    output, (h1, c1) = encoder_lstm_forward(token, params, hidden, cell)
    output = jax.block_until_ready(output)
    h1 = jax.block_until_ready(h1)
    c1 = jax.block_until_ready(c1)

    h_ref, c_ref = _reference_step(token, params,
                                   hidden.reshape(1, hidden_size),
                                   cell.reshape(1, hidden_size))
    assert output.shape == (1, 1, hidden_size)
    assert h1.shape == (1, 1, hidden_size) and c1.shape == (1, 1, hidden_size)
    assert jnp.allclose(output.reshape(1, -1), h_ref, atol=1e-4)
    assert jnp.allclose(h1.reshape(1, -1), h_ref, atol=1e-4)
    assert jnp.allclose(c1.reshape(1, -1), c_ref, atol=1e-4)

    # ---- 2) whole sequence fused into one pallas_call ----
    tokens = jax.random.randint(jax.random.PRNGKey(1), (seq_len,), 0, input_size)
    out_seq, (h_T, c_T) = encoder_lstm_forward(tokens, params, hidden, cell)
    out_seq = jax.block_until_ready(out_seq)

    h_r = hidden.reshape(1, hidden_size)
    c_r = cell.reshape(1, hidden_size)
    outs_r = []
    for t in range(seq_len):
        h_r, c_r = _reference_step(int(tokens[t]), params, h_r, c_r)
        outs_r.append(h_r)
    outs_r = jnp.stack(outs_r, axis=0)  # (T, 1, H)

    assert out_seq.shape == (seq_len, 1, hidden_size)
    assert jnp.allclose(out_seq, outs_r, atol=1e-4)
    assert jnp.allclose(h_T.reshape(1, -1), h_r, atol=1e-4)
    assert jnp.allclose(c_T.reshape(1, -1), c_r, atol=1e-4)

    print("KERNEL_OK")
</pallas_src>

<mosaic_0001>
module attributes {stable_mosaic.version = 11 : i64} {
  func.func @_encoder_lstm_kernel(%arg0: memref<8x128xf32, #tpu.memory_space<vmem>>, %arg1: memref<256x512xf32, #tpu.memory_space<vmem>>, %arg2: memref<1x512xf32, #tpu.memory_space<vmem>>, %arg3: memref<1x128xf32, #tpu.memory_space<vmem>>, %arg4: memref<1x128xf32, #tpu.memory_space<vmem>>, %arg5: memref<8x128xf32, #tpu.memory_space<vmem>>, %arg6: memref<1x128xf32, #tpu.memory_space<vmem>>, %arg7: memref<1x256xf32, #tpu.memory_space<vmem>>, %arg8: memref<1x128xf32, #tpu.memory_space<vmem>>) attributes {dimension_semantics = [], scalar_prefetch = 0 : i64, scratch_operands = 2 : i64, tpu.core_type = #tpu.core_type<tc>} {
    %cst = arith.constant 0.000000e+00 : f32
    %0 = vector.broadcast %cst : f32 to vector<8x128xf32>
    %c0 = arith.constant 0 : index
    %c0_0 = arith.constant 0 : index
    %1 = vector.load %arg5[%c0, %c0_0] : memref<8x128xf32, #tpu.memory_space<vmem>>, vector<8x128xf32>
    tpu.vector_store %arg5[%c0, %c0_0], %0 {strides = array<i32>} : memref<8x128xf32, #tpu.memory_space<vmem>>, vector<8x128xf32>,
    %c0_1 = arith.constant 0 : index
    %c0_2 = arith.constant 0 : index
    %2 = vector.load %arg3[%c0_1, %c0_2] : memref<1x128xf32, #tpu.memory_space<vmem>>, vector<1x128xf32>
    %c0_3 = arith.constant 0 : index
    %c128 = arith.constant 128 : index
    %3 = vector.load %arg7[%c0_3, %c128] : memref<1x256xf32, #tpu.memory_space<vmem>>, vector<1x128xf32>
    tpu.vector_store %arg7[%c0_3, %c128], %2 {strides = array<i32>} : memref<1x256xf32, #tpu.memory_space<vmem>>, vector<1x128xf32>,
    %c0_4 = arith.constant 0 : index
    %c0_5 = arith.constant 0 : index
    %4 = vector.load %arg4[%c0_4, %c0_5] : memref<1x128xf32, #tpu.memory_space<vmem>>, vector<1x128xf32>
    %c0_6 = arith.constant 0 : index
    %c0_7 = arith.constant 0 : index
    %5 = vector.load %arg8[%c0_6, %c0_7] : memref<1x128xf32, #tpu.memory_space<vmem>>, vector<1x128xf32>
    tpu.vector_store %arg8[%c0_6, %c0_7], %4 {strides = array<i32>} : memref<1x128xf32, #tpu.memory_space<vmem>>, vector<1x128xf32>,
    %c0_i32 = arith.constant 0 : i32
    %6 = arith.index_cast %c0_i32 : i32 to index
    %c0_8 = arith.constant 0 : index
    %7 = vector.load %arg0[%6, %c0_8] : memref<8x128xf32, #tpu.memory_space<vmem>>, vector<1x128xf32>
    %c0_9 = arith.constant 0 : index
    %c0_10 = arith.constant 0 : index
    %8 = vector.load %arg7[%c0_9, %c0_10] : memref<1x256xf32, #tpu.memory_space<vmem>>, vector<1x128xf32>
    tpu.vector_store %arg7[%c0_9, %c0_10], %7 {strides = array<i32>} : memref<1x256xf32, #tpu.memory_space<vmem>>, vector<1x128xf32>,
    %c0_11 = arith.constant 0 : index
    %c0_12 = arith.constant 0 : index
    %9 = vector.load %arg7[%c0_11, %c0_12] : memref<1x256xf32, #tpu.memory_space<vmem>>, vector<1x256xf32>
    %c0_13 = arith.constant 0 : index
    %c0_14 = arith.constant 0 : index
    %10 = vector.load %arg1[%c0_13, %c0_14] : memref<256x512xf32, #tpu.memory_space<vmem>>, vector<256x512xf32>
    %cst_15 = arith.constant dense<0.000000e+00> : vector<1x512xf32>
    %11 = tpu.matmul %9, %10, %cst_15 {dimension_numbers = #tpu.dot_dimension_numbers<[1], [0], [0], [1], [0, 0, 1, 1], [], []>} : vector<1x256xf32>, vector<256x512xf32>, vector<1x512xf32> -> vector<1x512xf32>
    %c0_16 = arith.constant 0 : index
    %c0_17 = arith.constant 0 : index
    %12 = vector.load %arg2[%c0_16, %c0_17] : memref<1x512xf32, #tpu.memory_space<vmem>>, vector<1x512xf32>
    %13 = arith.addf %11, %12 : vector<1x512xf32>
    %14 = vector.extract_strided_slice %13 {offsets = [0, 0], sizes = [1, 384], strides = [1, 1]} : vector<1x512xf32> to vector<1x384xf32>
    %15 = arith.negf %14 : vector<1x384xf32>
    %16 = math.exp %15 : vector<1x384xf32>
    %cst_18 = arith.constant 1.000000e+00 : f32
    %17 = vector.broadcast %cst_18 : f32 to vector<1x384xf32>
    %18 = arith.addf %17, %16 : vector<1x384xf32>
    %19 = arith.divf %17, %18 : vector<1x384xf32>
    %20 = vector.extract_strided_slice %19 {offsets = [0, 0], sizes = [1, 128], strides = [1, 1]} : vector<1x384xf32> to vector<1x128xf32>
    %21 = vector.extract_strided_slice %19 {offsets = [0, 128], sizes = [1, 128], strides = [1, 1]} : vector<1x384xf32> to vector<1x128xf32>
    %22 = vector.extract_strided_slice %19 {offsets = [0, 256], sizes = [1, 128], strides = [1, 1]} : vector<1x384xf32> to vector<1x128xf32>
    %23 = vector.extract_strided_slice %13 {offsets = [0, 384], sizes = [1, 128], strides = [1, 1]} : vector<1x512xf32> to vector<1x128xf32>
    %24 = math.tanh %23 : vector<1x128xf32>
    %c0_19 = arith.constant 0 : index
    %c0_20 = arith.constant 0 : index
    %25 = vector.load %arg8[%c0_19, %c0_20] : memref<1x128xf32, #tpu.memory_space<vmem>>, vector<1x128xf32>
    %26 = arith.mulf %21, %25 : vector<1x128xf32>
    %27 = arith.mulf %20, %24 : vector<1x128xf32>
    %28 = arith.addf %26, %27 : vector<1x128xf32>
    %29 = math.tanh %28 : vector<1x128xf32>
    %30 = arith.mulf %22, %29 : vector<1x128xf32>
    %c0_21 = arith.constant 0 : index
    %c0_22 = arith.constant 0 : index
    %31 = vector.load %arg8[%c0_21, %c0_22] : memref<1x128xf32, #tpu.memory_space<vmem>>, vector<1x128xf32>
    tpu.vector_store %arg8[%c0_21, %c0_22], %28 {strides = array<i32>} : memref<1x128xf32, #tpu.memory_space<vmem>>, vector<1x128xf32>,
    %c0_23 = arith.constant 0 : index
    %c128_24 = arith.constant 128 : index
    %32 = vector.load %arg7[%c0_23, %c128_24] : memref<1x256xf32, #tpu.memory_space<vmem>>, vector<1x128xf32>
    tpu.vector_store %arg7[%c0_23, %c128_24], %30 {strides = array<i32>} : memref<1x256xf32, #tpu.memory_space<vmem>>, vector<1x128xf32>,
    %33 = arith.index_cast %c0_i32 : i32 to index
    %c0_25 = arith.constant 0 : index
    %34 = vector.load %arg5[%33, %c0_25] : memref<8x128xf32, #tpu.memory_space<vmem>>, vector<1x128xf32>
    tpu.vector_store %arg5[%33, %c0_25], %30 {strides = array<i32>} : memref<8x128xf32, #tpu.memory_space<vmem>>, vector<1x128xf32>,
    %c1_i32 = arith.constant 1 : i32
    %c0_26 = arith.constant 0 : index
    %c0_27 = arith.constant 0 : index
    %35 = vector.load %arg8[%c0_26, %c0_27] : memref<1x128xf32, #tpu.memory_space<vmem>>, vector<1x128xf32>
    %c0_28 = arith.constant 0 : index
    %c0_29 = arith.constant 0 : index
    %36 = vector.load %arg6[%c0_28, %c0_29] : memref<1x128xf32, #tpu.memory_space<vmem>>, vector<1x128xf32>
    tpu.vector_store %arg6[%c0_28, %c0_29], %35 {strides = array<i32>} : memref<1x128xf32, #tpu.memory_space<vmem>>, vector<1x128xf32>,
    return
  }
}

</mosaic_0001>

<bundles_post_ra>
// kernel: tpu_custom_call.1
= control target key start
LH: loop header
LB: loop body
LE: loop exit
PB: predicated region body
PF: predicated region fallthrough
CT: control target
= control target key end

     0   :  { %12 = vsyncpa [#allocation5], 0  ;;  %s801_s0 = inlined_call_operand.hbm [shape: f32[8,128], index: 0, kind: input, shape index: {}]   ;;  %s802_s1 = inlined_call_operand.hbm [shape: f32[256,512], index: 1, kind: input, shape index: {}]   ;;  %s803_s2 = inlined_call_operand.vmem [shape: f32[1,512], index: 2, kind: input, shape index: {}]   ;;  %s804_s3 = inlined_call_operand.vmem [shape: f32[1,128], index: 3, kind: input, shape index: {}]   ;;  %s805_s4 = inlined_call_operand.vmem [shape: f32[1,128], index: 4, kind: input, shape index: {}]   ;;  %s806_s5 = inlined_call_operand.hbm [shape: f32[8,128], index: 5, kind: output, shape index: {0}]   ;;  %s807_s6 = inlined_call_operand.hbm [shape: f32[1,128], index: 6, kind: output, shape index: {1}]  }
   0x1   :  { %13 = vsyncpa [#allocation8], 0 }
   0x2   :  { %14 = vsyncpa [#allocation6], 0 }
   0x3   :  { %15 = vsyncpa [#allocation11], 0  ;;  %s675_s21 = smov [#allocation4]   ;;  %s676_s23 = smov [#allocation7]  }
   0x4   :  { %s22_s22 = sshll.u32 %s675_s21, 4  ;;  %s31_s24 = sshll.u32 %s676_s23, 4  ;;  %s23_s22 = int_to_ptr.vmem [resolvable:$true] %s22_s22  ;;  %s717_s24 = int_to_ptr.vmem [resolvable:$true] %s31_s24 }
   0x5   :  { %s579_s27 = scalar_lea.hbm %s801_s0, 128 }
   0x6   :  { %p580_p0 = scmp.ne.s32.totalorder %s801_s0, %s579_s27  ;;  %p583_p1 = scmp.lt.u32.totalorder %s579_s27, %s801_s0 }
   0x8   :  { %p585_p2 = pnand %p583_p1, %p580_p0 }
   0xa   :  { %588 = shalt.err (!%p585_p2)
}
   0xb   :  { %s589_s8 = scalar_lea.vmem %s23_s22, 128  ;;  %p594_p4 = scmp.lt.s32.totalorder %s23_s22, %s23_s22 }
   0xc   :  { %p590_p3 = scmp.ne.s32.totalorder %s23_s22, %s589_s8  ;;  %p595_p5 = scmp.lt.s32.totalorder %s589_s8, %s589_s8 }
   0xe   :  { %p596_p6 = por %p595_p5, %p594_p4 }
  0x10   :  { %p597_p7 = pnand %p596_p6, %p590_p3 }
  0x12   :  { %600 = shalt.err (!%p597_p7)
}
  0x13   :  { %25 = dma.hbm_to_vmem [thread:$0]  %s801_s0, 128, %s23_s22, [#allocation5]  }
  0x14   :  { %s601_s13 = scalar_lea.hbm %s802_s1, 16384 }
  0x15   :  { %p602_p8 = scmp.ne.s32.totalorder %s802_s1, %s601_s13  ;;  %p605_p9 = scmp.lt.u32.totalorder %s601_s13, %s802_s1 }
  0x17   :  { %p607_p10 = pnand %p605_p9, %p602_p8 }
  0x19   :  { %610 = shalt.err (!%p607_p10)
}
  0x1a   :  { %s611_s18 = scalar_lea.vmem %s717_s24, 16384  ;;  %p616_p12 = scmp.lt.s32.totalorder %s717_s24, %s717_s24 }
  0x1b   :  { %p612_p11 = scmp.ne.s32.totalorder %s717_s24, %s611_s18  ;;  %p617_p13 = scmp.lt.s32.totalorder %s611_s18, %s611_s18 }
  0x1d   :  { %p618_p0 = por %p617_p13, %p616_p12 }
  0x1f   :  { %p619_p1 = pnand %p618_p0, %p612_p11 }
  0x21   :  { %622 = shalt.err (!%p619_p1)
}
  0x22   :  { %s677_s0 = smov 512   ;;  %s678_s19 = smov 32  }
  0x23   :  { %37 = dma.hbm_to_vmem [thread:$0]  %s802_s1, 16384, %s717_s24, [#allocation8], %s677_s0, %s677_s0, %s678_s19  }
  0x24   :  { %667 = dma.done.wait [#allocation5], 128  }
  0x25   :  { %668 = vsyncadd [#allocation5], 4294967168 }
  0x26   :  { %669 = dma.done.wait [#allocation8], 16384  }
  0x27   :  { %670 = vsyncadd [#allocation8], 4294950912  ;;  %v63_v0 = vld [vmem:[#allocation7 + $0x8] sm:$0xff]  ;;  %v62_v2 = vld [vmem:[#allocation7] sm:$0xff]  ;;  %s681_s26 = smov [#allocation9]  }
  0x28   :  { %v67_v1 = vld [vmem:[#allocation7 + $0x28] sm:$0xff]  ;;  %v66_v4 = vld [vmem:[#allocation7 + $0x20] sm:$0xff]  ;;  %v65_v18 = vld [vmem:[#allocation7 + $0x18] sm:$0xff]  ;;  %s401_s27 = sshll.u32 %s681_s26, 4  ;;  %s402_s27 = int_to_ptr.vmem [resolvable:$true] %s401_s27 }
  0x29   :  { %v428_v3 = vpack.c.bf16 %v67_v1, %v63_v0  ;;  %v71_v5 = vld [vmem:[#allocation7 + $0x48] sm:$0xff]  ;;  %v430_v7 = vpack.c.bf16 %v66_v4, %v62_v2  ;;  %v70_v9 = vld [vmem:[#allocation7 + $0x40] sm:$0xff]  ;;  %v69_v19 = vld [vmem:[#allocation7 + $0x38] sm:$0xff] }
  0x2a   :  { %v75_v6 = vld [vmem:[#allocation7 + $0x68] sm:$0xff]  ;;  %v74_v10 = vld [vmem:[#allocation7 + $0x60] sm:$0xff]  ;;  %v492_v21 = vpack.c.bf16 %v69_v19, %v65_v18  ;;  %v64_v22 = vld [vmem:[#allocation7 + $0x10] sm:$0xff] }
  0x2b   :  { %v432_v8 = vpack.c.bf16 %v75_v6, %v71_v5  ;;  %v79_v11 = vld [vmem:[#allocation7 + $0x88] sm:$0xff]  ;;  %429 = vmatprep.subr.bf16.mxu0 %v428_v3  ;;  %v434_v13 = vpack.c.bf16 %v74_v10, %v70_v9  ;;  %v78_v14 = vld [vmem:[#allocation7 + $0x80] sm:$0xff]  ;;  %v68_v23 = vld [vmem:[#allocation7 + $0x30] sm:$0xff] }
  0x2c   :  { %v83_v12 = vld [vmem:[#allocation7 + $0xa8] sm:$0xff]  ;;  %431 = vmatpush1.bf16.msra.mxu0 %v430_v7  ;;  %v82_v15 = vld [vmem:[#allocation7 + $0xa0] sm:$0xff]  ;;  %v494_v24 = vpack.c.bf16 %v68_v23, %v64_v22  ;;  %493 = vmatprep.subr.bf16.mxu1 %v492_v21  ;;  %v73_v26 = vld [vmem:[#allocation7 + $0x58] sm:$0xff] }
  0x2d   :  { %433 = vmatprep.subr.bf16.mxu0 %v432_v8  ;;  %v436_v16 = vpack.c.bf16 %v83_v12, %v79_v11  ;;  %v87_v17 = vld [vmem:[#allocation7 + $0xc8] sm:$0xff]  ;;  %v438_v25 = vpack.c.bf16 %v82_v15, %v78_v14  ;;  %v77_v27 = vld [vmem:[#allocation7 + $0x78] sm:$0xff]  ;;  %v72_v28 = vld [vmem:[#allocation7 + $0x50] sm:$0xff] }
  0x2e   :  { %v91_v20 = vld [vmem:[#allocation7 + $0xe8] sm:$0xff]  ;;  %v86_v30 = vld [vmem:[#allocation7 + $0xc0] sm:$0xff]  ;;  %495 = vmatpush1.bf16.msra.mxu1 %v494_v24  ;;  %v496_v32 = vpack.c.bf16 %v77_v27, %v73_v26  ;;  %v76_v33 = vld [vmem:[#allocation7 + $0x70] sm:$0xff] }
  0x2f   :  { %v440_v29 = vpack.c.bf16 %v91_v20, %v87_v17  ;;  %v90_v31 = vld [vmem:[#allocation7 + $0xe0] sm:$0xff]  ;;  %v95_v34 = vld [vmem:[#allocation7 + $0x108] sm:$0xff]  ;;  %v498_v36 = vpack.c.bf16 %v76_v33, %v72_v28  ;;  %v81_v37 = vld [vmem:[#allocation7 + $0x98] sm:$0xff] }
  0x30   :  { %435 = vmatpush1.bf16.msra.mxu0 %v434_v13  ;;  %v99_v35 = vld [vmem:[#allocation7 + $0x128] sm:$0xff]  ;;  %497 = vmatprep.subr.bf16.mxu1 %v496_v32  ;;  %v85_v38 = vld [vmem:[#allocation7 + $0xb8] sm:$0xff]  ;;  %v80_v39 = vld [vmem:[#allocation7 + $0x90] sm:$0xff]  ;;  %v442_v41 = vpack.c.bf16 %v90_v31, %v86_v30 }
  0x31   :  { %437 = vmatprep.subr.bf16.mxu0 %v436_v16  ;;  %v84_v40 = vld [vmem:[#allocation7 + $0xb0] sm:$0xff]  ;;  %v94_v42 = vld [vmem:[#allocation7 + $0x100] sm:$0xff]  ;;  %v500_v44 = vpack.c.bf16 %v85_v38, %v81_v37  ;;  %v444_v45 = vpack.c.bf16 %v99_v35, %v95_v34  ;;  %v103_v46 = vld [vmem:[#allocation7 + $0x148] sm:$0xff] }
  0x32   :  { %v98_v43 = vld [vmem:[#allocation7 + $0x120] sm:$0xff]  ;;  %499 = vmatpush1.bf16.msra.mxu1 %v498_v36  ;;  %v502_v47 = vpack.c.bf16 %v84_v40, %v80_v39  ;;  %v89_v48 = vld [vmem:[#allocation7 + $0xd8] sm:$0xff]  ;;  %v107_v50 = vld [vmem:[#allocation7 + $0x168] sm:$0xff] }
  0x33   :  { %v93_v49 = vld [vmem:[#allocation7 + $0xf8] sm:$0xff]  ;;  %501 = vmatprep.subr.bf16.mxu1 %v500_v44  ;;  %v88_v52 = vld [vmem:[#allocation7 + $0xd0] sm:$0xff]  ;;  %v446_v54 = vpack.c.bf16 %v98_v43, %v94_v42  ;;  %v448_v57 = vpack.c.bf16 %v107_v50, %v103_v46  ;;  %v102_v58 = vld [vmem:[#allocation7 + $0x140] sm:$0xff] }
  0x34   :  { %439 = vmatpush1.bf16.msra.mxu0 %v438_v25  ;;  %v504_v51 = vpack.c.bf16 %v93_v49, %v89_v48  ;;  %v92_v53 = vld [vmem:[#allocation7 + $0xf0] sm:$0xff]  ;;  %v97_v55 = vld [vmem:[#allocation7 + $0x118] sm:$0xff]  ;;  %v106_v59 = vld [vmem:[#allocation7 + $0x160] sm:$0xff] }
  0x35   :  { %441 = vmatprep.subr.bf16.mxu0 %v440_v29  ;;  %v101_v56 = vld [vmem:[#allocation7 + $0x138] sm:$0xff]  ;;  %v111_v60 = vld [vmem:[#allocation7 + $0x188] sm:$0xff]  ;;  %v506_v61 = vpack.c.bf16 %v92_v53, %v88_v52  ;;  %v96_v0 = vld [vmem:[#allocation7 + $0x110] sm:$0xff]  ;;  %v450_v4 = vpack.c.bf16 %v106_v59, %v102_v58 }
  0x36   :  { %503 = vmatpush1.bf16.msra.mxu1 %v502_v47  ;;  %v115_v62 = vld [vmem:[#allocation7 + $0x1a8] sm:$0xff]  ;;  %v508_v63 = vpack.c.bf16 %v101_v56, %v97_v55  ;;  %v100_v1 = vld [vmem:[#allocation7 + $0x130] sm:$0xff]  ;;  %v105_v2 = vld [vmem:[#allocation7 + $0x158] sm:$0xff] }
  0x37   :  { %505 = vmatprep.subr.bf16.mxu1 %v504_v51  ;;  %v109_v3 = vld [vmem:[#allocation7 + $0x178] sm:$0xff]  ;;  %v452_v5 = vpack.c.bf16 %v115_v62, %v111_v60  ;;  %v110_v6 = vld [vmem:[#allocation7 + $0x180] sm:$0xff]  ;;  %v119_v8 = vld [vmem:[#allocation7 + $0x1c8] sm:$0xff]  ;;  %v510_v9 = vpack.c.bf16 %v100_v1, %v96_v0 }
  0x38   :  { %443 = vmatpush1.bf16.msra.mxu0 %v442_v41  ;;  %v114_v7 = vld [vmem:[#allocation7 + $0x1a0] sm:$0xff]  ;;  %v123_v10 = vld [vmem:[#allocation7 + $0x1e8] sm:$0xff]  ;;  %v512_v11 = vpack.c.bf16 %v109_v3, %v105_v2  ;;  %v104_v12 = vld [vmem:[#allocation7 + $0x150] sm:$0xff]  ;;  %v52_v41 = vlaneseq }
  0x39   :  { %445 = vmatprep.subr.bf16.mxu0 %v444_v45  ;;  %v108_v13 = vld [vmem:[#allocation7 + $0x170] sm:$0xff]  ;;  %v113_v14 = vld [vmem:[#allocation7 + $0x198] sm:$0xff]  ;;  %v454_v16 = vpack.c.bf16 %v114_v7, %v110_v6  ;;  %v456_v17 = vpack.c.bf16 %v123_v10, %v119_v8  ;;  %v118_v18 = vld [vmem:[#allocation7 + $0x1c0] sm:$0xff] }
  0x3a   :  { %507 = vmatpush1.bf16.msra.mxu1 %v506_v61  ;;  %v117_v15 = vld [vmem:[#allocation7 + $0x1b8] sm:$0xff]  ;;  %v122_v19 = vld [vmem:[#allocation7 + $0x1e0] sm:$0xff]  ;;  %v127_v20 = vld [vmem:[#allocation7 + $0x208] sm:$0xff]  ;;  %v514_v21 = vpack.c.bf16 %v108_v13, %v104_v12  ;;  %vm748_vm0 = vcmp.lt.s32.totalorder %v52_v41, 128 }
  0x3b   :  { %509 = vmatprep.subr.bf16.mxu1 %v508_v63  ;;  %v131_v22 = vld [vmem:[#allocation7 + $0x228] sm:$0xff]  ;;  %v516_v23 = vpack.c.bf16 %v117_v15, %v113_v14  ;;  %v112_v24 = vld [vmem:[#allocation7 + $0x190] sm:$0xff]  ;;  %v121_v26 = vld [vmem:[#allocation7 + $0x1d8] sm:$0xff]  ;;  %v458_v28 = vpack.c.bf16 %v122_v19, %v118_v18 }
  0x3c   :  { %447 = vmatpush1.bf16.msra.mxu0 %v446_v54  ;;  %v116_v25 = vld [vmem:[#allocation7 + $0x1b0] sm:$0xff]  ;;  %v125_v27 = vld [vmem:[#allocation7 + $0x1f8] sm:$0xff]  ;;  %v460_v29 = vpack.c.bf16 %v131_v22, %v127_v20  ;;  %v126_v30 = vld [vmem:[#allocation7 + $0x200] sm:$0xff] }
  0x3d   :  { %449 = vmatprep.subr.bf16.mxu0 %v448_v57  ;;  %v130_v31 = vld [vmem:[#allocation7 + $0x220] sm:$0xff]  ;;  %v135_v32 = vld [vmem:[#allocation7 + $0x248] sm:$0xff]  ;;  %v518_v33 = vpack.c.bf16 %v116_v25, %v112_v24  ;;  %v520_v35 = vpack.c.bf16 %v125_v27, %v121_v26  ;;  %v120_v36 = vld [vmem:[#allocation7 + $0x1d0] sm:$0xff] }
  0x3e   :  { %511 = vmatpush1.bf16.msra.mxu1 %v510_v9  ;;  %v139_v34 = vld [vmem:[#allocation7 + $0x268] sm:$0xff]  ;;  %v124_v37 = vld [vmem:[#allocation7 + $0x1f0] sm:$0xff]  ;;  %v129_v38 = vld [vmem:[#allocation7 + $0x218] sm:$0xff]  ;;  %v462_v40 = vpack.c.bf16 %v130_v31, %v126_v30 }
  0x3f   :  { %513 = vmatprep.subr.bf16.mxu1 %v512_v11  ;;  %v133_v39 = vld [vmem:[#allocation7 + $0x238] sm:$0xff]  ;;  %v464_v42 = vpack.c.bf16 %v139_v34, %v135_v32  ;;  %v134_v43 = vld [vmem:[#allocation7 + $0x240] sm:$0xff]  ;;  %v143_v45 = vld [vmem:[#allocation7 + $0x288] sm:$0xff]  ;;  %v522_v46 = vpack.c.bf16 %v124_v37, %v120_v36 }
  0x40   :  { %451 = vmatpush1.bf16.msra.mxu0 %v450_v4  ;;  %v138_v44 = vld [vmem:[#allocation7 + $0x260] sm:$0xff]  ;;  %v147_v47 = vld [vmem:[#allocation7 + $0x2a8] sm:$0xff]  ;;  %v524_v48 = vpack.c.bf16 %v133_v39, %v129_v38  ;;  %v128_v49 = vld [vmem:[#allocation7 + $0x210] sm:$0xff]  ;;  %v759_v4 = vshrl.u32 %v52_v41, 7 }
  0x41   :  { %453 = vmatprep.subr.bf16.mxu0 %v452_v5  ;;  %v132_v50 = vld [vmem:[#allocation7 + $0x230] sm:$0xff]  ;;  %v137_v51 = vld [vmem:[#allocation7 + $0x258] sm:$0xff]  ;;  %v466_v53 = vpack.c.bf16 %v138_v44, %v134_v43  ;;  %v142_v54 = vld [vmem:[#allocation7 + $0x280] sm:$0xff]  ;;  %v468_v57 = vpack.c.bf16 %v147_v47, %v143_v45 }
  0x42   :  { %515 = vmatpush1.bf16.msra.mxu1 %v514_v21  ;;  %v141_v52 = vld [vmem:[#allocation7 + $0x278] sm:$0xff]  ;;  %v146_v55 = vld [vmem:[#allocation7 + $0x2a0] sm:$0xff]  ;;  %v151_v58 = vld [vmem:[#allocation7 + $0x2c8] sm:$0xff]  ;;  %v526_v60 = vpack.c.bf16 %v132_v50, %v128_v49 }
  0x43   :  { %517 = vmatprep.subr.bf16.mxu1 %v516_v23  ;;  %v155_v59 = vld [vmem:[#allocation7 + $0x2e8] sm:$0xff]  ;;  %v136_v61 = vld [vmem:[#allocation7 + $0x250] sm:$0xff]  ;;  %v528_v62 = vpack.c.bf16 %v141_v52, %v137_v51  ;;  %v59_v1 = vld [vmem:[#allocation4] sm:$0x1]  ;;  %v470_v5 = vpack.c.bf16 %v146_v55, %v142_v54 }
  0x44   :  { %455 = vmatpush1.bf16.msra.mxu0 %v454_v16  ;;  %v140_v63 = vld [vmem:[#allocation7 + $0x270] sm:$0xff]  ;;  %v145_v2 = vld [vmem:[#allocation7 + $0x298] sm:$0xff]  ;;  %60 = vst.msk [vmem:[#allocation2] sm:$0x1] %vm748_vm0, %v59_v1  ;;  %v472_v6 = vpack.c.bf16 %v155_v59, %v151_v58  ;;  %v150_v7 = vld [vmem:[#allocation7 + $0x2c0] sm:$0xff]  ;;  %v194_v1 = vsub.s32 0, %v759_v4 }
  0x45   :  { %457 = vmatprep.subr.bf16.mxu0 %v456_v17  ;;  %v51_v0 = vld [vmem:[%s804_s3] sm:$0x1]  ;;  %v149_v3 = vld [vmem:[#allocation7 + $0x2b8] sm:$0xff]  ;;  %v154_v8 = vld [vmem:[#allocation7 + $0x2e0] sm:$0xff]  ;;  %v530_v10 = vpack.c.bf16 %v140_v63, %v136_v61  ;;  %v198_v17 = vsub.s32 1, %v759_v4 }
  0x46   :  { %519 = vmatpush1.bf16.msra.mxu1 %v518_v33  ;;  %56 = vst.msk [vmem:[#allocation2 + $0x1] sm:$0x1] %vm748_vm0, %v51_v0  ;;  %v159_v9 = vld [vmem:[#allocation7 + $0x308] sm:$0xff]  ;;  %v532_v12 = vpack.c.bf16 %v149_v3, %v145_v2  ;;  %v144_v13 = vld [vmem:[#allocation7 + $0x290] sm:$0xff]  ;;  %v153_v15 = vld [vmem:[#allocation7 + $0x2d8] sm:$0xff]  ;;  %v474_v18 = vpack.c.bf16 %v154_v8, %v150_v7 }
  0x47   :  { %521 = vmatprep.subr.bf16.mxu1 %v520_v35  ;;  %v163_v11 = vld [vmem:[#allocation7 + $0x328] sm:$0xff]  ;;  %v148_v14 = vld [vmem:[#allocation7 + $0x2b0] sm:$0xff]  ;;  %v157_v16 = vld [vmem:[#allocation7 + $0x2f8] sm:$0xff] }
  0x48   :  { %459 = vmatpush1.bf16.msra.mxu0 %v458_v28  ;;  %v158_v19 = vld [vmem:[#allocation7 + $0x300] sm:$0xff]  ;;  %v476_v20 = vpack.c.bf16 %v163_v11, %v159_v9  ;;  %v167_v22 = vld [vmem:[#allocation7 + $0x348] sm:$0xff]  ;;  %v534_v24 = vpack.c.bf16 %v148_v14, %v144_v13  ;;  %v536_v25 = vpack.c.bf16 %v157_v16, %v153_v15  ;;  %v152_v26 = vld [vmem:[#allocation7 + $0x2d0] sm:$0xff]  ;;  %v679_v13 = vmov 0.0  }
  0x49   :  { %461 = vmatprep.subr.bf16.mxu0 %v460_v29  ;;  %v162_v21 = vld [vmem:[#allocation7 + $0x320] sm:$0xff]  ;;  %v171_v23 = vld [vmem:[#allocation7 + $0x368] sm:$0xff]  ;;  %v156_v27 = vld [vmem:[#allocation7 + $0x2f0] sm:$0xff]  ;;  %50 = vst [vmem:[#allocation9] sm:$0xff] %v679_v13 }
  0x4a   :  { %523 = vmatpush1.bf16.msra.mxu1 %v522_v46  ;;  %v161_v29 = vld [vmem:[#allocation7 + $0x318] sm:$0xff]  ;;  %v478_v32 = vpack.c.bf16 %v162_v21, %v158_v19  ;;  %v480_v33 = vpack.c.bf16 %v171_v23, %v167_v22  ;;  %v166_v34 = vld [vmem:[#allocation7 + $0x340] sm:$0xff]  ;;  %v175_v36 = vld [vmem:[#allocation7 + $0x388] sm:$0xff]  ;;  %v538_v37 = vpack.c.bf16 %v156_v27, %v152_v26  ;;  %v217_v26 = vsub.s32 3, %v759_v4 }
  0x4b   :  { %525 = vmatprep.subr.bf16.mxu1 %v524_v48  ;;  %v165_v30 = vld [vmem:[#allocation7 + $0x338] sm:$0xff]  ;;  %v170_v35 = vld [vmem:[#allocation7 + $0x360] sm:$0xff]  ;;  %v179_v38 = vld [vmem:[#allocation7 + $0x3a8] sm:$0xff] }
  0x4c   :  { %463 = vmatpush1.bf16.msra.mxu0 %v462_v40  ;;  %v540_v39 = vpack.c.bf16 %v165_v30, %v161_v29  ;;  %v160_v40 = vld [vmem:[#allocation7 + $0x310] sm:$0xff]  ;;  %v173_v43 = vld [vmem:[#allocation7 + $0x378] sm:$0xff]  ;;  %v482_v44 = vpack.c.bf16 %v170_v35, %v166_v34  ;;  %v484_v45 = vpack.c.bf16 %v179_v38, %v175_v36  ;;  %v174_v46 = vld [vmem:[#allocation7 + $0x380] sm:$0xff] }
  0x4d   :  { %465 = vmatprep.subr.bf16.mxu0 %v464_v42  ;;  %v61_v28 = vld [vmem:[#allocation2] sm:$0x3]  ;;  %v169_v42 = vld [vmem:[#allocation7 + $0x358] sm:$0xff]  ;;  %v178_v47 = vld [vmem:[#allocation7 + $0x3a0] sm:$0xff] }
  0x4e   :  { %527 = vmatpush1.bf16.msra.mxu1 %v526_v60  ;;  %v199_v31 = vrot.slane %v61_v28, %v198_v17  ;;  %v164_v41 = vld [vmem:[#allocation7 + $0x330] sm:$0xff]  ;;  %v183_v48 = vld [vmem:[#allocation7 + $0x3c8] sm:$0xff]  ;;  %v544_v51 = vpack.c.bf16 %v173_v43, %v169_v42  ;;  %v177_v54 = vld [vmem:[#allocation7 + $0x398] sm:$0xff] }
  0x4f   :  { %529 = vmatprep.subr.bf16.mxu1 %v528_v62  ;;  %v542_v49 = vpack.c.bf16 %v164_v41, %v160_v40  ;;  %v187_v50 = vld [vmem:[#allocation7 + $0x3e8] sm:$0xff]  ;;  %v168_v52 = vld [vmem:[#allocation7 + $0x350] sm:$0xff]  ;;  %v181_v55 = vld [vmem:[#allocation7 + $0x3b8] sm:$0xff] }
  0x50   :  { %467 = vmatpush1.bf16.msra.mxu0 %v466_v53  ;;  %287 = vmatprep.mubr.f32.mxu0 %v199_v31  ;;  %v172_v53 = vld [vmem:[#allocation7 + $0x370] sm:$0xff]  ;;  %v488_v58 = vpack.c.bf16 %v187_v50, %v183_v48  ;;  %v182_v59 = vld [vmem:[#allocation7 + $0x3c0] sm:$0xff]  ;;  %v548_v62 = vpack.c.bf16 %v181_v55, %v177_v54  ;;  %v185_v2 = vld [vmem:[#allocation7 + $0x3d8] sm:$0xff] }
  0x51   :  { %469 = vmatprep.subr.bf16.mxu0 %v468_v57  ;;  %358 = vmatprep.mubr.f32.mxu1 %v199_v31  ;;  %v486_v57 = vpack.c.bf16 %v178_v47, %v174_v46  ;;  %v186_v60 = vld [vmem:[#allocation7 + $0x3e0] sm:$0xff]  ;;  %v546_v61 = vpack.c.bf16 %v172_v53, %v168_v52  ;;  %v176_v63 = vld [vmem:[#allocation7 + $0x390] sm:$0xff]  ;;  %v189_v3 = vld [vmem:[#allocation7 + $0x3f8] sm:$0xff] }
  0x52   :  { %531 = vmatpush1.bf16.msra.mxu1 %v530_v10  ;;  %v180_v0 = vld [vmem:[#allocation7 + $0x3b0] sm:$0xff]  ;;  %v552_v7 = vpack.c.bf16 %v189_v3, %v185_v2  ;;  %v195_v10 = vrot.slane %v61_v28, %v194_v1 }
  0x53   :  { %533 = vmatprep.subr.bf16.mxu1 %v532_v12  ;;  %v184_v8 = vld [vmem:[#allocation7 + $0x3d0] sm:$0xff] }
  0x54   :  { %471 = vmatpush1.bf16.msra.mxu0 %v470_v5  ;;  %v490_v5 = vpack.c.bf16 %v186_v60, %v182_v59  ;;  %v188_v9 = vld [vmem:[#allocation7 + $0x3f0] sm:$0xff] }
  0x55   :  { %473 = vmatprep.subr.bf16.mxu0 %v472_v6  ;;  %v550_v6 = vpack.c.bf16 %v180_v0, %v176_v63  ;;  %v554_v11 = vpack.c.bf16 %v188_v9, %v184_v8  ;;  %v57_v12 = vld [vmem:[%s805_s4] sm:$0x1] }
  0x56   :  { %535 = vmatpush1.bf16.msra.mxu1 %v534_v24  ;;  %58 = vst [vmem:[#allocation3] sm:$0x1] %v57_v12  ;;  %v190_v14 = vld [vmem:[%s803_s2] sm:$0xf]  ;;  %s680_s2 = smov [#allocation10]  }
  0x57   :  { %537 = vmatprep.subr.bf16.mxu1 %v536_v25  ;;  %v206_v15 = vrot.slane %v190_v14, %v194_v1  ;;  %v210_v16 = vrot.slane %v190_v14, %v198_v17  ;;  %v218_v30 = vrot.slane %v190_v14, %v217_v26  ;;  %s411_s4 = sshll.u32 %s680_s2, 4  ;;  %s412_s4 = int_to_ptr.vmem [resolvable:$true] %s411_s4 }
  0x58   :  { %475 = vmatpush1.bf16.msra.mxu0 %v474_v18  ;;  %v213_v18 = vsub.s32 2, %v759_v4  ;;  %s623_s28 = scalar_lea.vmem %s412_s4, 16  ;;  %s627_s29 = scalar_lea.vmem %s412_s4, 32 }
  0x59   :  { %477 = vmatprep.subr.bf16.mxu0 %v476_v20  ;;  %p624_p2 = scmp.ne.s32.totalorder %s412_s4, %s623_s28  ;;  %p628_p3 = scmp.lt.s32.totalorder %s412_s4, %s412_s4 }
  0x5a   :  { %539 = vmatpush1.bf16.msra.mxu1 %v538_v37  ;;  %v214_v24 = vrot.slane %v190_v14, %v213_v18  ;;  %p629_p4 = scmp.lt.s32.totalorder %s627_s29, %s623_s28 }
  0x5b   :  { %541 = vmatprep.subr.bf16.mxu1 %v540_v39 }
  0x5c   :  { %479 = vmatpush1.bf16.msra.mxu0 %v478_v32  ;;  %p630_p5 = por %p629_p4, %p628_p3 }
  0x5d   :  { %481 = vmatprep.subr.bf16.mxu0 %v480_v33  ;;  %v384_v38 = vld [vmem:[#allocation3] sm:$0x1] }
  0x5e   :  { %543 = vmatpush1.bf16.msra.mxu1 %v542_v49  ;;  %p631_p6 = pnand %p630_p5, %p624_p2 }
  0x5f   :  { %545 = vmatprep.subr.bf16.mxu1 %v544_v51 }
  0x60   :  { %483 = vmatpush1.bf16.msra.mxu0 %v482_v44 }
  0x61   :  { %485 = vmatprep.subr.bf16.mxu0 %v484_v45 }
  0x62   :  { %547 = vmatpush1.bf16.msra.mxu1 %v546_v61 }
  0x63   :  { %549 = vmatprep.subr.bf16.mxu1 %v548_v62 }
  0x64   :  { %487 = vmatpush1.bf16.msra.mxu0 %v486_v57 }
  0x65   :  { %489 = vmatprep.subr.bf16.mxu0 %v488_v58 }
  0x66   :  { %551 = vmatpush1.bf16.msra.mxu1 %v550_v6 }
  0x67   :  { %553 = vmatprep.subr.bf16.mxu1 %v552_v7 }
  0x68   :  { %491 = vmatpush1.bf16.msra.mxu0 %v490_v5 }
  0x6a   :  { %555 = vmatpush1.bf16.msra.mxu1 %v554_v11 }
  0x6b   :  { %288 = vmatmul.mubr.f32.vlgmr.msra.gmra.mrb[0].mxu0 %v195_v10 }
  0x6d   :  { %359 = vmatmul.mubr.f32.vlgmr.msra.gmra.mrb[0].mxu1 %v195_v10 }
 0x13e   :  { %v289_v19 = vpop.f32.mrb[0].mxu0 }
 0x13f   :  { %v290_v20 = vadd.f32 %v289_v19, %v206_v15  ;;  %v291_v21 = vpop.f32.mrb[1].mxu0 }
 0x140   :  { %v292_v22 = vadd.f32 %v291_v21, %v210_v16  ;;  %v360_v27 = vpop.f32.mrb[0].mxu1 }
 0x141   :  { %v425_v23 = vmul.f32 -1.442695, %v290_v20  ;;  %v362_v28 = vpop.f32.mrb[1].mxu1  ;;  %v361_v29 = vadd.f32 %v360_v27, %v214_v24 }
 0x142   :  { %v426_v25 = vmul.f32 -1.442695, %v292_v22  ;;  %v363_v32 = vadd.f32 %v362_v28, %v218_v30 }
 0x143   :  { %563 = vpow2.f32 %v425_v23  ;;  %v427_v31 = vmul.f32 -1.442695, %v361_v29 }
 0x144   :  { %565 = vpow2.f32 %v426_v25 }
 0x145   :  { %567 = vpow2.f32 %v427_v31 }
 0x146   :  { %569 = vtanh.f32 %v363_v32 }
 0x14d   :  { %v564_v17 = vpop.eup %563 }
 0x14e   :  { %v566_v33 = vpop.eup %565  ;;  %v374_v34 = vadd.f32 1.0, %v564_v17 }
 0x14f   :  { %v375_v35 = vadd.f32 1.0, %v566_v33  ;;  %v568_v36 = vpop.eup %567 }
 0x150   :  { %571 = vrcp.f32 %v374_v34  ;;  %v570_v37 = vpop.eup %569  ;;  %v376_v39 = vadd.f32 1.0, %v568_v36 }
 0x151   :  { %573 = vrcp.f32 %v375_v35 }
 0x152   :  { %575 = vrcp.f32 %v376_v39 }
 0x15a   :  { %v572_v4 = vpop.eup %571 }
 0x15b   :  { %v574_v40 = vpop.eup %573  ;;  %v386_v41 = vmul.f32 %v572_v4, %v570_v37 }
 0x15c   :  { %v385_v42 = vmul.f32 %v574_v40, %v384_v38  ;;  %v576_v45 = vpop.eup %575 }
 0x15e   :  { %v387_v43 = vadd.f32 %v386_v41, %v385_v42 }
 0x160   :  { %577 = vtanh.f32 %v387_v43  ;;  %390 = vst [vmem:[#allocation3] sm:$0x1] %v387_v43 }
 0x167   :  { %v393_v44 = vld [vmem:[#allocation3] sm:$0x1] }
 0x168   :  { %394 = vst [vmem:[#allocation10] sm:$0x1] %v393_v44 }
 0x169   :  { %634 = shalt.err (!%p631_p6)
}
 0x16a   :  { %s635_s8 = scalar_lea.hbm %s807_s6, 16 }
 0x16b   :  { %p636_p7 = scmp.ne.s32.totalorder %s807_s6, %s635_s8  ;;  %p639_p8 = scmp.lt.u32.totalorder %s635_s8, %s807_s6 }
 0x16d   :  { %p641_p9 = pnand %p639_p8, %p636_p7 }
 0x16f   :  { %644 = shalt.err (!%p641_p9)
}
 0x170   :  { %414 = dma.vmem_to_hbm [thread:$0]  %s412_s4, 16, %s807_s6, [#allocation11]   ;;  %v578_v46 = vpop.eup %577 }
 0x171   :  { %v389_v47 = vmul.f32 %v578_v46, %v576_v45  ;;  %s645_s15 = scalar_lea.vmem %s402_s27, 128  ;;  %p650_p11 = scmp.lt.s32.totalorder %s402_s27, %s402_s27 }
 0x172   :  { %p646_p10 = scmp.ne.s32.totalorder %s402_s27, %s645_s15  ;;  %p651_p12 = scmp.lt.s32.totalorder %s645_s15, %s645_s15 }
 0x173   :  { %391 = vst.msk [vmem:[#allocation2 + $0x1] sm:$0x1] %vm748_vm0, %v389_v47  ;;  %392 = vst [vmem:[#allocation9] sm:$0x1] %v389_v47 }
 0x174   :  { %p652_p13 = por %p651_p12, %p650_p11 }
 0x176   :  { %p653_p0 = pnand %p652_p13, %p646_p10 }
 0x178   :  { %656 = shalt.err (!%p653_p0)
}
 0x179   :  { %s657_s18 = scalar_lea.hbm %s806_s5, 128 }
 0x17a   :  { %p658_p1 = scmp.ne.s32.totalorder %s806_s5, %s657_s18  ;;  %p661_p2 = scmp.lt.u32.totalorder %s657_s18, %s806_s5 }
 0x17c   :  { %p663_p3 = pnand %p661_p2, %p658_p1 }
 0x17e   :  { %666 = shalt.err (!%p663_p3)
}
 0x17f   :  { %404 = dma.vmem_to_hbm [thread:$0]  %s402_s27, 128, %s806_s5, [#allocation6]  }
 0x180   :  { %671 = dma.done.wait [#allocation6], 128  }
 0x181   :  { %672 = vsyncadd [#allocation6], 4294967168 }
 0x182   :  { %673 = dma.done.wait [#allocation11], 16  }
 0x183   :  { %674 = vsyncadd [#allocation11], 4294967280 }
 0x184   :  { %421 = vsyncpa [#allocation5], 1 }
 0x185   :  { %422 = vsyncpa [#allocation8], 1 }
 0x186   :  { %423 = vsyncpa [#allocation6], 1 }
 0x187   :  { %424 = vsyncpa [#allocation11], 1 }

</bundles_post_ra>
